<compile_context>
chip_gen: v5e
topology: v5e:2x2
jax: 0.10.0
libtpu: 0.0.40
codegen_flags: <defaults>
</compile_context>

<pallas_src>
import math
import functools

import numpy as np
import jax
import jax.numpy as jnp
from jax import lax
from jax.experimental import pallas as pl
from jax.experimental.pallas import tpu as pltpu


def _gaussian_taps_1d(size, sigma):
    """Normalized 1-D Gaussian taps (matches the torch per-axis construction)."""
    coords = np.arange(size, dtype=np.float64)
    mean = (size - 1) / 2.0
    g = (1.0 / (sigma * math.sqrt(2.0 * math.pi))) * np.exp(
        -(((coords - mean) / sigma) ** 2) / 2.0
    )
    g = g / g.sum()
    return tuple(float(v) for v in g)


def _vmem_limit_bytes():
    """Per-generation scoped-VMEM limit: ~3/4 of physical VMEM, capped at 100 MiB
    (v5e/v6e: 128 MiB physical -> ~96 MiB; v7x: 64 MiB physical -> ~48 MiB)."""
    cap = 64 * 1024 * 1024  # conservative fallback (v7x per-TensorCore VMEM)
    try:
        info = pltpu.get_tpu_info()
        for attr in ("vmem_capacity_bytes", "vmem_size_bytes", "vmem_bytes"):
            v = getattr(info, attr, None)
            if v:
                cap = int(v)
                break
    except Exception:
        pass
    return min((cap * 3) // 4, 100 * 1024 * 1024)


def _choose_block_planes(nc, per_plane_bytes, budget_bytes):
    """Largest divisor of `nc` whose block fits the VMEM budget, preferring >= 2
    grid steps (DMA/compute overlap + keeps both v7x TensorCores busy)."""
    cap = max(1, budget_bytes // max(per_plane_bytes, 1))
    fitting = [d for d in range(1, nc + 1) if nc % d == 0 and d <= cap]
    if not fitting:
        # TODO(synk): add (kH-1)-row-halo H tiling for multi-megapixel planes where
        # even a single (H, W) plane exceeds the per-block VMEM budget.
        return 1
    cb = max(fitting)
    if cb == nc and nc > 1:
        smaller = [d for d in fitting if d < nc]
        if smaller:
            cb = max(smaller)
    return cb


def _smoothing_kernel(x_ref, o_ref, tmp_ref, *, taps_h, taps_w):
    # x_ref:   (CB, H,    W)     input block  (planes on leading axis)
    # o_ref:   (CB, Hout, Wout)  output block
    # tmp_ref: (CB, Hout, W)     explicit f32 VMEM scratch for the vertical pass
    _, hout, wout = o_ref.shape
    kh, kw = len(taps_h), len(taps_w)

    # ---- Vertical (H) pass: sublane-axis tap windows read directly from the input
    # ref (no full-block f32 materialization), symmetric-pair factored.
    def vwin(i):
        return x_ref[:, i:i + hout, :].astype(jnp.float32)

    acc = None
    for i in range(kh // 2):
        term = taps_h[i] * (vwin(i) + vwin(kh - 1 - i))
        acc = term if acc is None else acc + term
    if kh % 2:
        m = kh // 2
        term = taps_h[m] * vwin(m)
        acc = term if acc is None else acc + term
    tmp_ref[...] = acc

    # ---- Horizontal (W) pass: lane-axis tap windows read from the f32 scratch ref,
    # symmetric-pair factored.  Static lane offsets -> XLU rotates on load.
    def hwin(j):
        return tmp_ref[:, :, j:j + wout]

    acc = None
    for j in range(kw // 2):
        term = taps_w[j] * (hwin(j) + hwin(kw - 1 - j))
        acc = term if acc is None else acc + term
    if kw % 2:
        m = kw // 2
        term = taps_w[m] * hwin(m)
        acc = term if acc is None else acc + term

    o_ref[...] = acc.astype(o_ref.dtype)


def gaussian_smoothing(x, kernel_size, sigma):
    """Equivalent of GaussianSmoothing(channels=C, kernel_size, sigma, dim=2)(x).

    x: (N, C, H, W) -> (N, C, H-kH+1, W-kW+1)  (valid depthwise cross-correlation).
    """
    N, C, H, W = x.shape
    if isinstance(kernel_size, (int, float)):
        kernel_size = [int(kernel_size)] * 2
    if isinstance(sigma, (int, float)):
        sigma = [float(sigma)] * 2
    kH, kW = int(kernel_size[0]), int(kernel_size[1])
    taps_h = _gaussian_taps_1d(kH, float(sigma[0]))
    taps_w = _gaussian_taps_1d(kW, float(sigma[1]))
    Hout, Wout = H - kH + 1, W - kW + 1

    NC = N * C
    x_flat = x.reshape(NC, H, W)  # free: no HBM data movement (NC-major layout kept)

    vmem_limit = _vmem_limit_bytes()
    itemsize = jnp.dtype(x.dtype).itemsize
    # Per-plane VMEM: double-buffered input + output blocks, plus the f32 scratch.
    per_plane = 2 * H * W * itemsize + 2 * Hout * Wout * itemsize + Hout * W * 4
    cb = _choose_block_planes(NC, per_plane, (vmem_limit * 3) // 5)
    grid = (NC // cb,)

    kernel_fn = functools.partial(_smoothing_kernel, taps_h=taps_h, taps_w=taps_w)

    out_flat = pl.pallas_call(
        kernel_fn,
        out_shape=jax.ShapeDtypeStruct((NC, Hout, Wout), x.dtype),
        grid=grid,
        in_specs=[pl.BlockSpec((cb, H, W), lambda b: (b, 0, 0))],
        out_specs=pl.BlockSpec((cb, Hout, Wout), lambda b: (b, 0, 0)),
        scratch_shapes=[pltpu.VMEM((cb, Hout, W), jnp.float32)],
        compiler_params=pltpu.CompilerParams(
            dimension_semantics=("parallel",),
            vmem_limit_bytes=vmem_limit,
        ),
    )(x_flat)

    return out_flat.reshape(N, C, Hout, Wout)  # free


def _reference(x, kernel_size, sigma):
    # Pure-JAX reference: depthwise valid cross-correlation (== F.conv2d, groups=C).
    N, C, H, W = x.shape
    if isinstance(kernel_size, (int, float)):
        kernel_size = [int(kernel_size)] * 2
    if isinstance(sigma, (int, float)):
        sigma = [float(sigma)] * 2
    th = np.asarray(_gaussian_taps_1d(int(kernel_size[0]), float(sigma[0])))
    tw = np.asarray(_gaussian_taps_1d(int(kernel_size[1]), float(sigma[1])))
    k2d = jnp.asarray(np.outer(th, tw), dtype=jnp.float32)  # == jointly-normalized 2-D kernel
    kH, kW = k2d.shape
    w = jnp.broadcast_to(k2d.reshape(1, 1, kH, kW), (C, 1, kH, kW))
    return lax.conv_general_dilated(
        x, w,
        window_strides=(1, 1),
        padding="VALID",
        dimension_numbers=("NCHW", "OIHW", "NCHW"),
        feature_group_count=C,
    )


if __name__ == "__main__":
    N, C, H, W = 2, 4, 16, 16
    kernel_size, sigma = 5, 1.5

    key = jax.random.PRNGKey(0)
    x = jax.random.normal(key, (N, C, H, W), dtype=jnp.float32)

    out = gaussian_smoothing(x, kernel_size, sigma)
    out = jax.block_until_ready(out)

    ref = _reference(x, kernel_size, sigma)
    assert out.shape == (N, C, H - kernel_size + 1, W - kernel_size + 1)
    assert jnp.allclose(out, ref, atol=1e-5, rtol=1e-5)

    print("KERNEL_OK")
</pallas_src>

<mosaic_0001>
module attributes {stable_mosaic.version = 11 : i64} {
  func.func @_smoothing_kernel(%arg0: i32, %arg1: memref<4x16x16xf32, #tpu.memory_space<vmem>>, %arg2: memref<4x12x12xf32, #tpu.memory_space<vmem>>, %arg3: memref<4x12x16xf32, #tpu.memory_space<vmem>>) attributes {dimension_semantics = [#tpu.dimension_semantics<parallel>], iteration_bounds = array<i64: 2>, scalar_prefetch = 0 : i64, scratch_operands = 1 : i64, tpu.core_type = #tpu.core_type<tc>, window_params = [{transform_indices = @transform_0, window_bounds = array<i64: 4, 16, 16>}, {transform_indices = @transform_1, window_bounds = array<i64: 4, 12, 12>}]} {
    %c0 = arith.constant 0 : index
    %c0_0 = arith.constant 0 : index
    %c0_1 = arith.constant 0 : index
    %0 = vector.load %arg1[%c0, %c0_0, %c0_1] : memref<4x16x16xf32, #tpu.memory_space<vmem>>, vector<4x12x16xf32>
    %c0_2 = arith.constant 0 : index
    %c4 = arith.constant 4 : index
    %c0_3 = arith.constant 0 : index
    %1 = vector.load %arg1[%c0_2, %c4, %c0_3] : memref<4x16x16xf32, #tpu.memory_space<vmem>>, vector<4x12x16xf32>
    %2 = arith.addf %0, %1 : vector<4x12x16xf32>
    %cst = arith.constant 0.120078385 : f32
    %3 = vector.broadcast %cst : f32 to vector<4x12x16xf32>
    %4 = arith.mulf %3, %2 : vector<4x12x16xf32>
    %c0_4 = arith.constant 0 : index
    %c1 = arith.constant 1 : index
    %c0_5 = arith.constant 0 : index
    %5 = vector.load %arg1[%c0_4, %c1, %c0_5] : memref<4x16x16xf32, #tpu.memory_space<vmem>>, vector<4x12x16xf32>
    %c0_6 = arith.constant 0 : index
    %c3 = arith.constant 3 : index
    %c0_7 = arith.constant 0 : index
    %6 = vector.load %arg1[%c0_6, %c3, %c0_7] : memref<4x16x16xf32, #tpu.memory_space<vmem>>, vector<4x12x16xf32>
    %7 = arith.addf %5, %6 : vector<4x12x16xf32>
    %cst_8 = arith.constant 0.233880758 : f32
    %8 = vector.broadcast %cst_8 : f32 to vector<4x12x16xf32>
    %9 = arith.mulf %8, %7 : vector<4x12x16xf32>
    %10 = arith.addf %4, %9 : vector<4x12x16xf32>
    %c0_9 = arith.constant 0 : index
    %c2 = arith.constant 2 : index
    %c0_10 = arith.constant 0 : index
    %11 = vector.load %arg1[%c0_9, %c2, %c0_10] : memref<4x16x16xf32, #tpu.memory_space<vmem>>, vector<4x12x16xf32>
    %cst_11 = arith.constant 0.292081714 : f32
    %12 = vector.broadcast %cst_11 : f32 to vector<4x12x16xf32>
    %13 = arith.mulf %12, %11 : vector<4x12x16xf32>
    %14 = arith.addf %10, %13 : vector<4x12x16xf32>
    %c0_12 = arith.constant 0 : index
    %c0_13 = arith.constant 0 : index
    %c0_14 = arith.constant 0 : index
    %15 = vector.load %arg3[%c0_12, %c0_13, %c0_14] : memref<4x12x16xf32, #tpu.memory_space<vmem>>, vector<4x12x16xf32>
    tpu.vector_store %arg3[%c0_12, %c0_13, %c0_14], %14 {strides = array<i32>} : memref<4x12x16xf32, #tpu.memory_space<vmem>>, vector<4x12x16xf32>,
    %c0_15 = arith.constant 0 : index
    %c0_16 = arith.constant 0 : index
    %c0_17 = arith.constant 0 : index
    %16 = vector.load %arg3[%c0_15, %c0_16, %c0_17] : memref<4x12x16xf32, #tpu.memory_space<vmem>>, vector<4x12x12xf32>
    %c0_18 = arith.constant 0 : index
    %c0_19 = arith.constant 0 : index
    %c4_20 = arith.constant 4 : index
    %17 = vector.load %arg3[%c0_18, %c0_19, %c4_20] : memref<4x12x16xf32, #tpu.memory_space<vmem>>, vector<4x12x12xf32>
    %18 = arith.addf %16, %17 : vector<4x12x12xf32>
    %cst_21 = arith.constant 0.120078385 : f32
    %19 = vector.broadcast %cst_21 : f32 to vector<4x12x12xf32>
    %20 = arith.mulf %19, %18 : vector<4x12x12xf32>
    %c0_22 = arith.constant 0 : index
    %c0_23 = arith.constant 0 : index
    %c1_24 = arith.constant 1 : index
    %21 = vector.load %arg3[%c0_22, %c0_23, %c1_24] : memref<4x12x16xf32, #tpu.memory_space<vmem>>, vector<4x12x12xf32>
    %c0_25 = arith.constant 0 : index
    %c0_26 = arith.constant 0 : index
    %c3_27 = arith.constant 3 : index
    %22 = vector.load %arg3[%c0_25, %c0_26, %c3_27] : memref<4x12x16xf32, #tpu.memory_space<vmem>>, vector<4x12x12xf32>
    %23 = arith.addf %21, %22 : vector<4x12x12xf32>
    %cst_28 = arith.constant 0.233880758 : f32
    %24 = vector.broadcast %cst_28 : f32 to vector<4x12x12xf32>
    %25 = arith.mulf %24, %23 : vector<4x12x12xf32>
    %26 = arith.addf %20, %25 : vector<4x12x12xf32>
    %c0_29 = arith.constant 0 : index
    %c0_30 = arith.constant 0 : index
    %c2_31 = arith.constant 2 : index
    %27 = vector.load %arg3[%c0_29, %c0_30, %c2_31] : memref<4x12x16xf32, #tpu.memory_space<vmem>>, vector<4x12x12xf32>
    %cst_32 = arith.constant 0.292081714 : f32
    %28 = vector.broadcast %cst_32 : f32 to vector<4x12x12xf32>
    %29 = arith.mulf %28, %27 : vector<4x12x12xf32>
    %30 = arith.addf %26, %29 : vector<4x12x12xf32>
    %c0_33 = arith.constant 0 : index
    %c0_34 = arith.constant 0 : index
    %c0_35 = arith.constant 0 : index
    %31 = vector.load %arg2[%c0_33, %c0_34, %c0_35] : memref<4x12x12xf32, #tpu.memory_space<vmem>>, vector<4x12x12xf32>
    tpu.vector_store %arg2[%c0_33, %c0_34, %c0_35], %30 {strides = array<i32>} : memref<4x12x12xf32, #tpu.memory_space<vmem>>, vector<4x12x12xf32>,
    return
  }
  func.func @transform_0(%arg0: i32) -> (i32, i32, i32) {
    %c0_i32 = arith.constant 0 : i32
    %c0_i32_0 = arith.constant 0 : i32
    %c0_i32_1 = arith.constant 0 : i32
    return %arg0, %c0_i32, %c0_i32_0 : i32, i32, i32
  }
  func.func @transform_1(%arg0: i32) -> (i32, i32, i32) {
    %c0_i32 = arith.constant 0 : i32
    %c0_i32_0 = arith.constant 0 : i32
    %c0_i32_1 = arith.constant 0 : i32
    return %arg0, %c0_i32, %c0_i32_0 : i32, i32, i32
  }
}

</mosaic_0001>

<bundles_post_ra>
// kernel: tpu_custom_call.1
= control target key start
LH: loop header
LB: loop body
LE: loop exit
PB: predicated region body
PF: predicated region fallthrough
CT: control target
= control target key end

     0   :  { %6 = vsyncpa [#allocation4], 0  ;;  %s903_s0 = inlined_call_operand.hbm [shape: f32[8,16,16], index: 0, kind: input, shape index: {}]   ;;  %s904_s1 = inlined_call_operand.vmem [shape: f32[8,12,12], index: 1, kind: output, shape index: {}]  }
   0x1   :  { %8 = vsyncpa [#allocation4 + $0x1], 0  ;;  %s656_s6 = smov 0   ;;  %s658_s7 = smov 0  }
   0x2   :  { %s660_s8 = smov 0   ;;  %s662_s9 = smov 0  }
   0x3 LB: > { %s513_s10 = sadd.s32 4294967295, %s639_s9   ;;  %s676_s11 = sadd.s32 1, %s639_s9   ;;  %s639_s9 = sphi %s662_s9, %s911_s9   ;;  %s635_s8 = sphi %s660_s8, %s910_s8   ;;  %s631_s7 = sphi %s658_s7, %s909_s7   ;;  %s627_s6 = sphi %s656_s6, %s908_s6  }
   0x4   : > { %s18_s12 = ssub.s32 %s639_s9, %s676_s11  ;;  %s21_s13 = sadd.s32 1, %s635_s8 }
   0x5   : > { %p19_p0 = scmp.eq.s32.totalorder %s18_s12, 0  ;;  %p28_p1 = scmp.ne.s32.totalorder %s635_s8, %s631_s7 }
   0x6   : > { %p29_p2 = scmp.eq.s32.totalorder %s639_s9, 0  ;;  %p34_p3 = scmp.ne.s32.totalorder %s631_s7, %s627_s6 }
   0x7   : > { %s686_s14 = scalar_select %p19_p0, %s635_s8, %s21_s13  }
   0x8   : > { %p688_p4 = por %p29_p2, %p28_p1  ;;  %p35_p5 = scmp.eq.s32.totalorder %s513_s10, 0 }
   0x9   : > { %p537_p6 = scmp.lt.s32.totalorder %s639_s9, 2  ;;  %s84_s17 = sand.u32 1, %s635_s8  }
   0xa   : > { %p695_p7 = por %p35_p5, %p34_p3  ;;  %s517_s18 = sshll.u32 %s84_s17, 6 }
   0xb   : > { %s529_s19 = sshll.u32 %s639_s9, 6  ;;  %s88_s23 = scalar_lea.vmem [#allocation3], %s517_s18 }
   0xc   : > { %s94_s22 = scalar_lea.hbm %s903_s0, %s529_s19  ;;  %s97_s24 = sshll.u32 %s88_s23, 4  ;;  %s98_s24 = int_to_ptr.vmem [resolvable:$true] %s97_s24 }
   0xd   : > { %s95_s25 = sshll.u32 %s94_s22, 4  ;;  %p706_p8 = pnand %p537_p6, %p688_p4  ;;  %s96_s25 = int_to_ptr.hbm [resolvable:$true] %s95_s25 }
   0xe   : > { %p521_p9 = scmp.ge.s32.totalorder %s639_s9, 1  ;;  %s85_s27 = scalar_lea.sflag [#allocation4], %s84_s17 }
   0xf   : > { %s575_s28 = sshra.s32 %s96_s25, 4  ;;  %p579_p11 = pneg %p706_p8  ;;  %s576_s28 = int_to_ptr.hbm [resolvable:$true] %s575_s28 }
  0x10   : > { %s577_s29 = scalar_lea.hbm %s576_s28, 64  ;;  %s582_s3 = scalar_lea.hbm %s903_s0, 128 }
  0x11   : > { %p578_p10 = scmp.ne.s32.totalorder %s576_s28, %s577_s29  ;;  %p583_p0 = scmp.lt.s32.totalorder %s576_s28, %s903_s0 }
  0x12   : > { %p584_p1 = scmp.lt.s32.totalorder %s582_s3, %s577_s29 }
  0x13   : > { %p580_p12 = pnand %p579_p11, %p578_p10 }
  0x14   : > { %p585_p2 = por %p584_p1, %p583_p0 }
  0x15   : > { %p581_p13 = pneg %p580_p12 }
  0x17   : > { %p586_p3 = pnand %p585_p2, %p581_p13 }
  0x19   : > { %589 = shalt.err (!%p586_p3)
}
  0x1a   : > { %s641_s6 = smov 128   ;;  %s642_s12 = smov 8  }
  0x1b   : > { %536 = dma.hbm_to_vmem [thread:$0]  (!%p706_p8), %s96_s25, 1024, %s98_s24, %s85_s27, %s641_s6, %s641_s6, %s642_s12  }
  0x1c   : > { %p105_p4 = scmp.lt.s32.totalorder %s639_s9, 3 }
  0x1e   : > { %p106_p5 = pnand %p521_p9, %p105_p4 }
  0x1f   : > { %s111_s13 = sand.u32 (!%p106_p5), 1, %s631_s7  }
  0x20   : > { %109 = sbr.rel (%p106_p5) target bundleno = 330 (0x14a), region = 24  ;;  %s522_s15 = sshll.u32 (!%p106_p5), %s111_s13, 6 }
  0x21   : > { %s112_s17 = scalar_lea.sflag (!%p106_p5), [#allocation4], %s111_s13  ;;  %s725_s18 = scalar_lea.vmem (!%p106_p5), [#allocation3], %s522_s15 }
  0x25   : > { %622 = dma.done.wait (%p695_p7), %s112_s17, 1024  }
  0x26   : > { %624 = vsyncadd (%p695_p7), %s112_s17, 4294966272  ;;  %v146_v0 = vld [vmem:[%s725_s18 + $0x10] sm:$0xff]  ;;  %vm240_vm0 = vcmask 130048   ;;  %v145_v6 = vld [vmem:[%s725_s18 + $0x8] sm:$0xf]  ;;  %vm242_vm1 = vcmask 125952  }
  0x27   : > { %v154_v1 = vld [vmem:[%s725_s18 + $0x14] sm:$0xff]  ;;  %v153_v9 = vld [vmem:[%s725_s18 + $0xc] sm:$0xf]  ;;  %v144_v18 = vld [vmem:[%s725_s18] sm:$0xff]  ;;  %s643_s16 = smov 124   ;;  %s644_s19 = smov 126  }
  0x28   : > { %v178_v2 = vld [vmem:[%s725_s18 + $0x11] sm:$0xff]  ;;  %v162_v3 = vadd.f32 %v154_v1, %v146_v0  ;;  %v177_v10 = vld [vmem:[%s725_s18 + $0x9] sm:$0xf]  ;;  %v161_v12 = vadd.f32 %v153_v9, %v145_v6  ;;  %v176_v22 = vld [vmem:[%s725_s18 + $0x1] sm:$0xff]  ;;  %s645_s20 = smov 127   ;;  %s523_s21 = sshll.u32 %s513_s10, 2 }
  0x29   : > { %v186_v4 = vld [vmem:[%s725_s18 + $0x13] sm:$0xff]  ;;  %v185_v13 = vld [vmem:[%s725_s18 + $0xb] sm:$0xf]  ;;  %v184_v23 = vld [vmem:[%s725_s18 + $0x3] sm:$0xff]  ;;  %p138_p6 = scmp.lt.s32.totalorder %s523_s21, 7  ;;  %vm436_vm2 = vcmask 93184  }
  0x2a   : > { %v218_v5 = vld [vmem:[%s725_s18 + $0x12] sm:$0xff]  ;;  %v194_v7 = vadd.f32 %v186_v4, %v178_v2  ;;  %v170_v11 = vmul.f32 0.120078385, %v162_v3  ;;  %v217_v14 = vld [vmem:[%s725_s18 + $0xa] sm:$0xf]  ;;  %v193_v16 = vadd.f32 %v185_v13, %v177_v10  ;;  %v216_v24 = vld [vmem:[%s725_s18 + $0x2] sm:$0xff]  ;;  %v192_v27 = vadd.f32 %v184_v23, %v176_v22 }
  0x2b   : > { %v226_v8 = vmul.f32 0.2920817, %v218_v5  ;;  %v225_v17 = vmul.f32 0.2920817, %v217_v14  ;;  %v152_v19 = vld [vmem:[%s725_s18 + $0x4] sm:$0xff]  ;;  %v150_v54 = vld [vmem:[%s725_s18 + $0x30] sm:$0xff] }
  0x2c   : > { %v202_v15 = vmul.f32 0.23388076, %v194_v7  ;;  %v169_v20 = vmul.f32 0.120078385, %v161_v12  ;;  %v160_v21 = vadd.f32 %v152_v19, %v144_v18  ;;  %v201_v26 = vmul.f32 0.23388076, %v193_v16 }
  0x2d   : > { %v224_v28 = vmul.f32 0.2920817, %v216_v24  ;;  %v149_v29 = vld [vmem:[%s725_s18 + $0x28] sm:$0xf]  ;;  %v157_v31 = vld [vmem:[%s725_s18 + $0x2c] sm:$0xf] }
  0x2e   : > { %v210_v25 = vadd.f32 %v202_v15, %v170_v11  ;;  %v168_v30 = vmul.f32 0.120078385, %v160_v21  ;;  %v181_v32 = vld [vmem:[%s725_s18 + $0x29] sm:$0xf]  ;;  %v209_v34 = vadd.f32 %v201_v26, %v169_v20  ;;  %v200_v35 = vmul.f32 0.23388076, %v192_v27 }
  0x2f   : > { %v165_v36 = vadd.f32 %v157_v31, %v149_v29  ;;  %v189_v37 = vld [vmem:[%s725_s18 + $0x2b] sm:$0xf]  ;;  %v148_v41 = vld [vmem:[%s725_s18 + $0x20] sm:$0xff]  ;;  %v147_v53 = vld [vmem:[%s725_s18 + $0x18] sm:$0xf]  ;;  %s913_s21 = smov (!%p138_p6, %s523_s21), 7 }
  0x30   : > { %v234_v33 = vadd.f32 %v226_v8, %v210_v25  ;;  %v221_v38 = vld [vmem:[%s725_s18 + $0x2a] sm:$0xf]  ;;  %v197_v39 = vadd.f32 %v189_v37, %v181_v32  ;;  %v180_v43 = vld [vmem:[%s725_s18 + $0x21] sm:$0xff]  ;;  %v233_v44 = vadd.f32 %v225_v17, %v209_v34  ;;  %v208_v45 = vadd.f32 %v200_v35, %v168_v30  ;;  %v155_v57 = vld [vmem:[%s725_s18 + $0x1c] sm:$0xf]  ;;  %s530_s22 = sshll.u32 %s913_s21, 4 }
  0x31   : > { %v229_v40 = vmul.f32 0.2920817, %v221_v38  ;;  %v156_v42 = vld [vmem:[%s725_s18 + $0x24] sm:$0xff]  ;;  %v173_v46 = vmul.f32 0.120078385, %v165_v36  ;;  %v163_v60 = vadd.f32 %v155_v57, %v147_v53  ;;  %v158_v2 = vld [vmem:[%s725_s18 + $0x34] sm:$0xff]  ;;  %s865_s25 = scalar_lea.vmem %s904_s1, %s530_s22 }
  0x32   : > { %244 = vst.msk [vmem:[#allocation2 + $0x10] sm:$0xff] %vm240_vm0, %v234_v33  ;;  %v164_v47 = vadd.f32 %v156_v42, %v148_v41  ;;  %v188_v48 = vld [vmem:[%s725_s18 + $0x23] sm:$0xff]  ;;  %v205_v50 = vmul.f32 0.23388076, %v197_v39  ;;  %v232_v55 = vadd.f32 %v224_v28, %v208_v45  ;;  %v179_v61 = vld [vmem:[%s725_s18 + $0x19] sm:$0xf]  ;;  %v166_v12 = vadd.f32 %v158_v2, %v150_v54 }
  0x33   : > { %v220_v49 = vld [vmem:[%s725_s18 + $0x22] sm:$0xff]  ;;  %v196_v51 = vadd.f32 %v188_v48, %v180_v43  ;;  %243 = vst.msk [vmem:[#allocation2 + $0x8] sm:$0xf] %vm242_vm1, %v233_v44  ;;  %v187_v62 = vld [vmem:[%s725_s18 + $0x1b] sm:$0xf]  ;;  %v182_v17 = vld [vmem:[%s725_s18 + $0x31] sm:$0xff] }
  0x34   : > { %v228_v52 = vmul.f32 0.2920817, %v220_v49  ;;  %v172_v56 = vmul.f32 0.120078385, %v164_v47  ;;  %v213_v58 = vadd.f32 %v205_v50, %v173_v46  ;;  %241 = vst.msk [vmem:[#allocation2] sm:$0xff] %vm240_vm0, %v232_v55  ;;  %v195_v63 = vadd.f32 %v187_v62, %v179_v61  ;;  %v190_v23 = vld [vmem:[%s725_s18 + $0x33] sm:$0xff] }
  0x35   : > { %v204_v59 = vmul.f32 0.23388076, %v196_v51  ;;  %v219_v0 = vld [vmem:[%s725_s18 + $0x1a] sm:$0xf]  ;;  %v171_v5 = vmul.f32 0.120078385, %v163_v60  ;;  %v198_v26 = vadd.f32 %v190_v23, %v182_v17 }
  0x36   : > { %v151_v1 = vld [vmem:[%s725_s18 + $0x38] sm:$0xf]  ;;  %v237_v3 = vadd.f32 %v229_v40, %v213_v58  ;;  %v227_v6 = vmul.f32 0.2920817, %v219_v0  ;;  %v159_v7 = vld [vmem:[%s725_s18 + $0x3c] sm:$0xf] }
  0x37   : > { %v212_v4 = vadd.f32 %v204_v59, %v172_v56  ;;  %v203_v8 = vmul.f32 0.23388076, %v195_v63  ;;  %v167_v9 = vadd.f32 %v159_v7, %v151_v1  ;;  %v183_v10 = vld [vmem:[%s725_s18 + $0x39] sm:$0xf]  ;;  %v174_v25 = vmul.f32 0.120078385, %v166_v12 }
  0x38   : > { %v191_v11 = vld [vmem:[%s725_s18 + $0x3b] sm:$0xf]  ;;  %247 = vst.msk [vmem:[#allocation2 + $0x28] sm:$0xf] %vm242_vm1, %v237_v3  ;;  %v222_v27 = vld [vmem:[%s725_s18 + $0x32] sm:$0xff]  ;;  %vm434_vm3 = vcmask 97280  }
  0x39   : > { %v770_v13 = vld [vmem:[#allocation2 + $0x10] sm:$0xff]  ;;  %v236_v14 = vadd.f32 %v228_v52, %v212_v4  ;;  %v199_v15 = vadd.f32 %v191_v11, %v183_v10  ;;  %v223_v16 = vld [vmem:[%s725_s18 + $0x3a] sm:$0xf]  ;;  %v211_v18 = vadd.f32 %v203_v8, %v171_v5  ;;  %v175_v19 = vmul.f32 0.120078385, %v167_v9 }
  0x3a   : > { %270 = vrot.lane.b32.xlu1 %v770_v13, %s643_s16  ;;  %v231_v20 = vmul.f32 0.2920817, %v223_v16  ;;  %v777_v21 = vld [vmem:[#allocation2 + $0x8] sm:$0xf]  ;;  %v206_v30 = vmul.f32 0.23388076, %v198_v26 }
  0x3b   : > { %246 = vst.msk [vmem:[#allocation2 + $0x20] sm:$0xff] %vm240_vm0, %v236_v14  ;;  %v207_v22 = vmul.f32 0.23388076, %v199_v15  ;;  %308 = vrot.lane.b32.xlu2 %v777_v21, %s644_s19  ;;  %v235_v24 = vadd.f32 %v227_v6, %v211_v18  ;;  %v784_v28 = vld [vmem:[#allocation2] sm:$0xff]  ;;  %v230_v31 = vmul.f32 0.2920817, %v222_v27 }
  0x3c   : > { %266 = vrot.lane.b32.xlu0 %v784_v28, %s643_s16  ;;  %v214_v33 = vadd.f32 %v206_v30, %v174_v25  ;;  %v387_v40 = vmul.f32 0.2920817, %v777_v21  ;;  %v388_v41 = vmul.f32 0.2920817, %v770_v13  ;;  %v386_v43 = vmul.f32 0.2920817, %v784_v28 }
  0x3d   : > { %v215_v29 = vadd.f32 %v207_v22, %v175_v19  ;;  %245 = vst.msk [vmem:[#allocation2 + $0x18] sm:$0xf] %vm242_vm1, %v235_v24 }
  0x3e   : > { %v238_v34 = vadd.f32 %v230_v31, %v214_v33 }
  0x3f   : > { %v239_v32 = vadd.f32 %v231_v20, %v215_v29  ;;  %v799_v36 = vld [vmem:[#allocation2 + $0x28] sm:$0xf] }
  0x40   : > { %248 = vst.msk [vmem:[#allocation2 + $0x30] sm:$0xff] %vm240_vm0, %v238_v34  ;;  %v391_v4 = vmul.f32 0.2920817, %v799_v36 }
  0x41   : > { %249 = vst.msk [vmem:[#allocation2 + $0x38] sm:$0xf] %vm242_vm1, %v239_v32 }
  0x42   : > { %306 = vrot.lane.b32.xlu1 %v784_v28, %s644_s19  ;;  %v797_v35 = vld [vmem:[#allocation2 + $0x20] sm:$0xff] }
  0x43   : > { %310 = vrot.lane.b32.xlu2 %v770_v13, %s644_s19  ;;  %v390_v44 = vmul.f32 0.2920817, %v797_v35 }
  0x44   : > { %268 = vrot.lane.b32.xlu0 %v777_v21, %s643_s16  ;;  %v803_v37 = vld [vmem:[#allocation2 + $0x18] sm:$0xf] }
  0x45   : > { %v389_v42 = vmul.f32 0.2920817, %v803_v37 }
  0x47   : > { %v813_v39 = vld [vmem:[#allocation2 + $0x30] sm:$0xff] }
  0x48   : > { %v809_v38 = vld [vmem:[#allocation2 + $0x38] sm:$0xf]  ;;  %v392_v10 = vmul.f32 0.2920817, %v813_v39 }
  0x49   : > { %v393_v11 = vmul.f32 0.2920817, %v809_v38 }
  0x4a   : > { %314 = vrot.lane.b32.xlu1 %v797_v35, %s644_s19 }
  0x4b   : > { %316 = vrot.lane.b32.xlu2 %v799_v36, %s644_s19 }
  0x4c   : > { %312 = vrot.lane.b32.xlu0 %v803_v37, %s644_s19 }
  0x52   : > { %320 = vrot.lane.b32.xlu1 %v809_v38, %s644_s19 }
  0x53   : > { %272 = vrot.lane.b32.xlu2 %v803_v37, %s643_s16 }
  0x54   : > { %318 = vrot.lane.b32.xlu0 %v813_v39, %s644_s19 }
  0x5a   : > { %276 = vrot.lane.b32.xlu1 %v799_v36, %s643_s16 }
  0x5b   : > { %278 = vrot.lane.b32.xlu2 %v813_v39, %s643_s16 }
  0x5c   : > { %274 = vrot.lane.b32.xlu0 %v797_v35, %s643_s16 }
  0x62   : > { %402 = vrot.lane.b32.xlu1 %v386_v43, %s644_s19 }
  0x63   : > { %404 = vrot.lane.b32.xlu2 %v387_v40, %s644_s19 }
  0x64   : > { %280 = vrot.lane.b32.xlu0 %v809_v38, %s643_s16 }
  0x6a   : > { %410 = vrot.lane.b32.xlu1 %v390_v44, %s644_s19 }
  0x6b   : > { %406 = vrot.lane.b32.xlu2 %v388_v41, %s644_s19 }
  0x6c   : > { %408 = vrot.lane.b32.xlu0 %v389_v42, %s644_s19 }
  0x95   : > { %v309_v45 = vpop.permute.xlu2 %308 }
  0x96   : > { %v331_v46 = vadd.f32 %v309_v45, %v777_v21 }
  0x98   : > { %v339_v47 = vmul.f32 0.23388076, %v331_v46 }
  0x9a   : > { %356 = vrot.lane.b32.xlu2 %v339_v47, %s645_s20 }
  0x9d   : > { %v311_v48 = vpop.permute.xlu2 %310 }
  0x9e   : > { %v332_v49 = vadd.f32 %v311_v48, %v770_v13 }
  0xa0   : > { %v340_v50 = vmul.f32 0.23388076, %v332_v49 }
  0xa2   : > { %358 = vrot.lane.b32.xlu0 %v340_v50, %s645_s20 }
  0xa5   : > { %v317_v51 = vpop.permute.xlu2 %316 }
  0xa6   : > { %v335_v52 = vadd.f32 %v317_v51, %v799_v36 }
  0xa8   : > { %v343_v53 = vmul.f32 0.23388076, %v335_v52 }
  0xaa   : > { %364 = vrot.lane.b32.xlu0 %v343_v53, %s645_s20 }
  0xac   : > { %v271_v54 = vpop.permute.xlu1 %270 }
  0xad   : > { %v273_v9 = vpop.permute.xlu2 %272 }
  0xae   : > { %v267_v55 = vpop.permute.xlu0 %266  ;;  %v293_v47 = vadd.f32 %v273_v9, %v803_v37 }
  0xaf   : > { %v290_v33 = vadd.f32 %v267_v55, %v784_v28 }
  0xb1   : > { %v298_v41 = vmul.f32 0.120078385, %v290_v33 }
  0xb4   : > { %v307_v56 = vpop.permute.xlu1 %306 }
  0xb5   : > { %v330_v57 = vadd.f32 %v307_v56, %v784_v28  ;;  %v279_v12 = vpop.permute.xlu2 %278 }
  0xb6   : > { %v269_v59 = vpop.permute.xlu0 %268 }
  0xb7   : > { %v338_v58 = vmul.f32 0.23388076, %v330_v57  ;;  %v291_v16 = vadd.f32 %v269_v59, %v777_v21  ;;  %v292_v21 = vadd.f32 %v271_v54, %v770_v13  ;;  %v296_v57 = vadd.f32 %v279_v12, %v813_v39 }
  0xb9   : > { %354 = vrot.lane.b32.xlu1 %v338_v58, %s645_s20  ;;  %v299_v17 = vmul.f32 0.120078385, %v291_v16  ;;  %v300_v26 = vmul.f32 0.120078385, %v292_v21  ;;  %v304_v58 = vmul.f32 0.120078385, %v296_v57 }
  0xbc   : > { %v315_v60 = vpop.permute.xlu1 %314 }
  0xbd   : > { %v334_v61 = vadd.f32 %v315_v60, %v797_v35  ;;  %v405_v14 = vpop.permute.xlu2 %404 }
  0xbe   : > { %v313_v63 = vpop.permute.xlu0 %312 }
  0xbf   : > { %v342_v62 = vmul.f32 0.23388076, %v334_v61  ;;  %v333_v0 = vadd.f32 %v313_v63, %v803_v37 }
  0xc1   : > { %362 = vrot.lane.b32.xlu2 %v342_v62, %s645_s20  ;;  %v341_v1 = vmul.f32 0.23388076, %v333_v0 }
  0xc3   : > { %360 = vrot.lane.b32.xlu1 %v341_v1, %s645_s20 }
  0xc4   : > { %v321_v2 = vpop.permute.xlu1 %320 }
  0xc5   : > { %v337_v3 = vadd.f32 %v321_v2, %v809_v38  ;;  %v407_v15 = vpop.permute.xlu2 %406 }
  0xc6   : > { %v319_v5 = vpop.permute.xlu0 %318 }
  0xc7   : > { %v345_v6 = vmul.f32 0.23388076, %v337_v3  ;;  %v336_v7 = vadd.f32 %v319_v5, %v813_v39 }
  0xc9   : > { %412 = vrot.lane.b32.xlu2 %v391_v4, %s644_s19  ;;  %v344_v8 = vmul.f32 0.23388076, %v336_v7 }
  0xcb   : > { %366 = vrot.lane.b32.xlu0 %v344_v8, %s645_s20  ;;  %368 = vrot.lane.b32.xlu1 %v345_v6, %s645_s20 }
  0xcc   : > { %v277_v25 = vpop.permute.xlu1 %276 }
  0xcd   : > { %v295_v28 = vadd.f32 %v277_v25, %v799_v36 }
  0xce   : > { %v275_v20 = vpop.permute.xlu0 %274 }
  0xcf   : > { %v294_v34 = vadd.f32 %v275_v20, %v797_v35  ;;  %v301_v35 = vmul.f32 0.120078385, %v293_v47  ;;  %v303_v49 = vmul.f32 0.120078385, %v295_v28 }
  0xd1   : > { %v302_v42 = vmul.f32 0.120078385, %v294_v34 }
  0xd3   : > { %414 = vrot.lane.b32.xlu0 %v392_v10, %s644_s19  ;;  %416 = vrot.lane.b32.xlu1 %v393_v11, %s644_s19 }
  0xd4   : > { %v403_v31 = vpop.permute.xlu1 %402 }
  0xd6   : > { %v281_v23 = vpop.permute.xlu0 %280 }
  0xd7   : > { %v297_v36 = vadd.f32 %v281_v23, %v809_v38 }
  0xd9   : > { %v305_v59 = vmul.f32 0.120078385, %v297_v36 }
  0xdc   : > { %v411_v32 = vpop.permute.xlu1 %410 }
  0xde   : > { %v409_v24 = vpop.permute.xlu0 %408 }
  0xf4   : > { %v357_v18 = vpop.permute.xlu2 %356 }
  0xf5   : > { %v379_v19 = vadd.f32 %v357_v18, %v299_v17 }
  0xf7   : > { %v427_v22 = vadd.f32 %v405_v14, %v379_v19 }
  0xf9   : > { %437 = vst.msk [vmem:[%s865_s25 + $0x8] sm:$0xf] %vm436_vm2, %v427_v22 }
 0x114   : > { %v359_v27 = vpop.permute.xlu0 %358 }
 0x115   : > { %v380_v29 = vadd.f32 %v359_v27, %v300_v26 }
 0x117   : > { %v428_v30 = vadd.f32 %v407_v15, %v380_v29 }
 0x119   : > { %438 = vst.msk [vmem:[%s865_s25 + $0x10] sm:$0xff] %vm434_vm3, %v428_v30 }
 0x11b   : > { %v363_v40 = vpop.permute.xlu2 %362 }
 0x11c   : > { %v382_v44 = vadd.f32 %v363_v40, %v302_v42  ;;  %v365_v48 = vpop.permute.xlu0 %364 }
 0x11d   : > { %v383_v53 = vadd.f32 %v365_v48, %v303_v49 }
 0x11e   : > { %v430_v46 = vadd.f32 %v411_v32, %v382_v44 }
 0x120   : > { %440 = vst.msk [vmem:[%s865_s25 + $0x20] sm:$0xff] %vm434_vm3, %v430_v46 }
 0x123   : > { %v413_v51 = vpop.permute.xlu2 %412 }
 0x124   : > { %v431_v55 = vadd.f32 %v413_v51, %v383_v53 }
 0x126   : > { %441 = vst.msk [vmem:[%s865_s25 + $0x28] sm:$0xf] %vm436_vm2, %v431_v55 }
 0x12b   : > { %v355_v43 = vpop.permute.xlu1 %354 }
 0x12c   : > { %v378_v45 = vadd.f32 %v355_v43, %v298_v41 }
 0x12e   : > { %v426_v13 = vadd.f32 %v403_v31, %v378_v45 }
 0x130   : > { %435 = vst.msk [vmem:[%s865_s25] sm:$0xff] %vm434_vm3, %v426_v13 }
 0x135   : > { %v361_v50 = vpop.permute.xlu1 %360 }
 0x136   : > { %v381_v52 = vadd.f32 %v361_v50, %v301_v35 }
 0x138   : > { %v429_v54 = vadd.f32 %v409_v24, %v381_v52 }
 0x13a   : > { %439 = vst.msk [vmem:[%s865_s25 + $0x18] sm:$0xf] %vm436_vm2, %v429_v54 }
 0x13d   : > { %v367_v37 = vpop.permute.xlu0 %366  ;;  %v369_v56 = vpop.permute.xlu1 %368 }
 0x13e   : > { %v384_v60 = vadd.f32 %v367_v37, %v304_v58  ;;  %v385_v61 = vadd.f32 %v369_v56, %v305_v59 }
 0x145   : > { %v415_v62 = vpop.permute.xlu0 %414  ;;  %v417_v63 = vpop.permute.xlu1 %416 }
 0x146   : > { %v432_v0 = vadd.f32 %v415_v62, %v384_v60  ;;  %v433_v1 = vadd.f32 %v417_v63, %v385_v61 }
 0x148   : > { %442 = vst.msk [vmem:[%s865_s25 + $0x30] sm:$0xff] %vm434_vm3, %v432_v0 }
 0x149   : > { %443 = vst.msk [vmem:[%s865_s25 + $0x38] sm:$0xf] %vm436_vm2, %v433_v1 }
 0x14a PF: > { %p11_p7 = scmp.ge.s32.totalorder %s676_s11, 4   ;;  %s908_s6 = smov %s631_s7 }
 0x14b   : > { %s909_s7 = smov %s635_s8  ;;  %s910_s8 = smov %s686_s14 }
 0x14c   : > { %s911_s9 = smov %s676_s11  ;;  %13 = sbr.rel (!%p11_p7) target bundleno = 3 (0x3), region = 64 }
 0x151   :  { %468 = vsyncpa [#allocation4], 1 }
 0x152   :  { %470 = vsyncpa [#allocation4 + $0x1], 1 }

</bundles_post_ra>
